<compile_context>
chip_gen: v6e
topology: v6e:2x2x1
jax: 0.10.0
libtpu: 0.0.40
codegen_flags: <defaults>
</compile_context>

<pallas_src>
import jax
import jax.numpy as jnp
from jax import lax
from jax.experimental import pallas as pl
from jax.experimental.pallas import tpu as pltpu


def make_spike_layer(Vth: float, decay: float, *, target_block_bytes: int = 2 << 20):
    """Returns spike_layer(x, now_T=None) with x of shape [B, T, C, H, W]."""
    Vth = float(Vth)
    decay = float(decay)

    def _largest_divisor_leq(n, limit):
        limit = max(1, min(n, limit))
        for d in range(limit, 0, -1):
            if n % d == 0:
                return d
        return 1

    def spike_layer(x, now_T=None):
        B, T_full, C, H, W = x.shape
        T = T_full if now_T is None else int(now_T)
        N = C * H * W

        x = x[:, :T]

        # Lane/sublane-dense layout with NO HBM transpose (reshape is free).
        if N % 128 == 0:
            Nt, L = N // 128, 128            # (Nt, 128) tiled dims, fully dense
        else:
            Nt, L = 1, N                     # fallback: full-extent last dim
        x4 = x.reshape(B, T, Nt, L)

        # Time-chunk size: big contiguous DMA blocks, but bounded so
        # double-buffered in+out blocks fit comfortably in VMEM on all gens
        # (v7x 64 MiB physical, v5e 16 MiB scoped default).
        bytes_per_step = Nt * L * 4
        tb_cap = max(1, target_block_bytes // max(1, bytes_per_step))
        Tb = _largest_divisor_leq(T, min(tb_cap, 128))
        n_tchunks = T // Tb

        block_bytes = Tb * bytes_per_step
        # in + out blocks, double-buffered, + mem scratch, + headroom.
        vmem_need = 2 * 2 * block_bytes + Nt * L * 4 + (4 << 20)
        vmem_limit = int(min(max(vmem_need, 16 << 20), 32 << 20))

        def spike_kernel(x_ref, o_ref, mem_ref):
            # x_ref / o_ref: (Tb, Nt, L) block for the current (batch, time-chunk)
            # mem_ref:       (Nt, L) persistent membrane potential scratch
            @pl.when(pl.program_id(1) == 0)
            def _():
                mem_ref[...] = jnp.zeros_like(mem_ref)

            def body(i, mem):
                # cast at load boundary (free on VPU); accumulate in f32
                mem = mem * decay + x_ref[i].astype(jnp.float32)
                spike = mem > Vth            # IEEE-equivalent to (mem - Vth > 0)
                o_ref[i] = spike.astype(o_ref.dtype)
                return jnp.where(spike, 0.0, mem)

            mem_ref[...] = lax.fori_loop(0, Tb, body, mem_ref[...], unroll=True)

        out4 = pl.pallas_call(
            spike_kernel,
            out_shape=jax.ShapeDtypeStruct((B, T, Nt, L), jnp.float32),
            grid_spec=pltpu.PrefetchScalarGridSpec(
                num_scalar_prefetch=0,
                grid=(B, n_tchunks),  # batch parallel, time recurrence innermost
                in_specs=[pl.BlockSpec((None, Tb, Nt, L),
                                       lambda b, tc: (b, tc, 0, 0))],
                out_specs=pl.BlockSpec((None, Tb, Nt, L),
                                       lambda b, tc: (b, tc, 0, 0)),
                scratch_shapes=[pltpu.VMEM((Nt, L), jnp.float32)],
            ),
            compiler_params=pltpu.CompilerParams(
                dimension_semantics=("parallel", "arbitrary"),
                vmem_limit_bytes=vmem_limit,
            ),
        )(x4)

        # Free reshape back to the module's output layout.
        return out4.reshape(B, T, C, H, W)

    return spike_layer


def spike_layer_ref(x, Vth, decay):
    """Pure-JAX reference (mirrors the PyTorch loop)."""
    T = x.shape[1]
    mem = jnp.zeros_like(x[:, 0], dtype=jnp.float32)
    outs = []
    for t in range(T):
        mem = mem * decay + x[:, t].astype(jnp.float32)
        spike = (mem > Vth).astype(jnp.float32)  # == act_fun(mem - Vth)
        mem = (1.0 - spike) * mem
        outs.append(spike)
    return jnp.stack(outs, axis=1)


if __name__ == "__main__":
    Vth, decay = 0.5, 0.25  # deterministic hyperparameters (module __init__ args)

    B, T, C, H, W = 2, 8, 4, 16, 16
    key = jax.random.PRNGKey(0)
    x = jax.random.normal(key, (B, T, C, H, W), dtype=jnp.float32)

    spike_layer = make_spike_layer(Vth, decay)
    out = jax.block_until_ready(spike_layer(x, now_T=T))

    ref = spike_layer_ref(x, Vth, decay)
    assert out.shape == (B, T, C, H, W)
    assert out.dtype == jnp.float32
    assert jnp.array_equal(out, ref), "mismatch vs reference"

    print("KERNEL_OK")
</pallas_src>

<mosaic_0001>
module attributes {stable_mosaic.version = 11 : i64} {
  func.func @spike_kernel(%arg0: i32, %arg1: i32, %arg2: memref<1x8x8x128xf32, #tpu.memory_space<vmem>>, %arg3: memref<1x8x8x128xf32, #tpu.memory_space<vmem>>, %arg4: memref<8x128xf32, #tpu.memory_space<vmem>>) attributes {dimension_semantics = [#tpu.dimension_semantics<parallel>, #tpu.dimension_semantics<arbitrary>], iteration_bounds = array<i64: 2, 1>, scalar_prefetch = 0 : i64, scratch_operands = 1 : i64, tpu.core_type = #tpu.core_type<tc>, window_params = [{transform_indices = @transform_0, window_bounds = array<i64: 1, 8, 8, 128>}, {transform_indices = @transform_1, window_bounds = array<i64: 1, 8, 8, 128>}]} {
    %c0_i32 = arith.constant 0 : i32
    %0 = arith.cmpi eq, %arg1, %c0_i32 : i32
    %1 = arith.extui %0 : i1 to i32
    %c0_i32_0 = arith.constant 0 : i32
    %2 = arith.cmpi ne, %1, %c0_i32_0 : i32
    scf.if %2 {
      %cst_76 = arith.constant 0.000000e+00 : f32
      %133 = vector.broadcast %cst_76 : f32 to vector<8x128xf32>
      %c0_77 = arith.constant 0 : index
      %c0_78 = arith.constant 0 : index
      %134 = vector.load %arg4[%c0_77, %c0_78] : memref<8x128xf32, #tpu.memory_space<vmem>>, vector<8x128xf32>
      tpu.vector_store %arg4[%c0_77, %c0_78], %133 {strides = array<i32>} : memref<8x128xf32, #tpu.memory_space<vmem>>, vector<8x128xf32>,
    } else {
    }
    %c0 = arith.constant 0 : index
    %c0_1 = arith.constant 0 : index
    %3 = vector.load %arg4[%c0, %c0_1] : memref<8x128xf32, #tpu.memory_space<vmem>>, vector<8x128xf32>
    %c0_i32_2 = arith.constant 0 : i32
    %cst = arith.constant 2.500000e-01 : f32
    %4 = vector.broadcast %cst : f32 to vector<8x128xf32>
    %5 = arith.mulf %3, %4 : vector<8x128xf32>
    %c0_3 = arith.constant 0 : index
    %6 = arith.index_cast %c0_i32_2 : i32 to index
    %c0_4 = arith.constant 0 : index
    %c0_5 = arith.constant 0 : index
    %7 = vector.load %arg2[%c0_3, %6, %c0_4, %c0_5] : memref<1x8x8x128xf32, #tpu.memory_space<vmem>>, vector<1x1x8x128xf32>
    %8 = vector.shape_cast %7 : vector<1x1x8x128xf32> to vector<8x128xf32>
    %9 = arith.addf %5, %8 : vector<8x128xf32>
    %cst_6 = arith.constant 5.000000e-01 : f32
    %10 = vector.broadcast %cst_6 : f32 to vector<8x128xf32>
    %11 = arith.cmpf ogt, %9, %10 : vector<8x128xf32>
    %12 = arith.extui %11 : vector<8x128xi1> to vector<8x128xi32>
    %13 = arith.sitofp %12 : vector<8x128xi32> to vector<8x128xf32>
    %c0_7 = arith.constant 0 : index
    %14 = arith.index_cast %c0_i32_2 : i32 to index
    %c0_8 = arith.constant 0 : index
    %c0_9 = arith.constant 0 : index
    %15 = vector.load %arg3[%c0_7, %14, %c0_8, %c0_9] : memref<1x8x8x128xf32, #tpu.memory_space<vmem>>, vector<1x1x8x128xf32>
    %16 = vector.shape_cast %15 : vector<1x1x8x128xf32> to vector<8x128xf32>
    %17 = vector.shape_cast %13 : vector<8x128xf32> to vector<1x1x8x128xf32>
    tpu.vector_store %arg3[%c0_7, %14, %c0_8, %c0_9], %17 {strides = array<i32>} : memref<1x8x8x128xf32, #tpu.memory_space<vmem>>, vector<1x1x8x128xf32>,
    %cst_10 = arith.constant 0.000000e+00 : f32
    %18 = vector.broadcast %cst_10 : f32 to vector<8x128xf32>
    %19 = arith.select %11, %18, %9 : vector<8x128xi1>, vector<8x128xf32>
    %c1_i32 = arith.constant 1 : i32
    %cst_11 = arith.constant 2.500000e-01 : f32
    %20 = vector.broadcast %cst_11 : f32 to vector<8x128xf32>
    %21 = arith.mulf %19, %20 : vector<8x128xf32>
    %c0_12 = arith.constant 0 : index
    %22 = arith.index_cast %c1_i32 : i32 to index
    %c0_13 = arith.constant 0 : index
    %c0_14 = arith.constant 0 : index
    %23 = vector.load %arg2[%c0_12, %22, %c0_13, %c0_14] : memref<1x8x8x128xf32, #tpu.memory_space<vmem>>, vector<1x1x8x128xf32>
    %24 = vector.shape_cast %23 : vector<1x1x8x128xf32> to vector<8x128xf32>
    %25 = arith.addf %21, %24 : vector<8x128xf32>
    %cst_15 = arith.constant 5.000000e-01 : f32
    %26 = vector.broadcast %cst_15 : f32 to vector<8x128xf32>
    %27 = arith.cmpf ogt, %25, %26 : vector<8x128xf32>
    %28 = arith.extui %27 : vector<8x128xi1> to vector<8x128xi32>
    %29 = arith.sitofp %28 : vector<8x128xi32> to vector<8x128xf32>
    %c0_16 = arith.constant 0 : index
    %30 = arith.index_cast %c1_i32 : i32 to index
    %c0_17 = arith.constant 0 : index
    %c0_18 = arith.constant 0 : index
    %31 = vector.load %arg3[%c0_16, %30, %c0_17, %c0_18] : memref<1x8x8x128xf32, #tpu.memory_space<vmem>>, vector<1x1x8x128xf32>
    %32 = vector.shape_cast %31 : vector<1x1x8x128xf32> to vector<8x128xf32>
    %33 = vector.shape_cast %29 : vector<8x128xf32> to vector<1x1x8x128xf32>
    tpu.vector_store %arg3[%c0_16, %30, %c0_17, %c0_18], %33 {strides = array<i32>} : memref<1x8x8x128xf32, #tpu.memory_space<vmem>>, vector<1x1x8x128xf32>,
    %cst_19 = arith.constant 0.000000e+00 : f32
    %34 = vector.broadcast %cst_19 : f32 to vector<8x128xf32>
    %35 = arith.select %27, %34, %25 : vector<8x128xi1>, vector<8x128xf32>
    %c2_i32 = arith.constant 2 : i32
    %cst_20 = arith.constant 2.500000e-01 : f32
    %36 = vector.broadcast %cst_20 : f32 to vector<8x128xf32>
    %37 = arith.mulf %35, %36 : vector<8x128xf32>
    %c0_21 = arith.constant 0 : index
    %38 = arith.index_cast %c2_i32 : i32 to index
    %c0_22 = arith.constant 0 : index
    %c0_23 = arith.constant 0 : index
    %39 = vector.load %arg2[%c0_21, %38, %c0_22, %c0_23] : memref<1x8x8x128xf32, #tpu.memory_space<vmem>>, vector<1x1x8x128xf32>
    %40 = vector.shape_cast %39 : vector<1x1x8x128xf32> to vector<8x128xf32>
    %41 = arith.addf %37, %40 : vector<8x128xf32>
    %cst_24 = arith.constant 5.000000e-01 : f32
    %42 = vector.broadcast %cst_24 : f32 to vector<8x128xf32>
    %43 = arith.cmpf ogt, %41, %42 : vector<8x128xf32>
    %44 = arith.extui %43 : vector<8x128xi1> to vector<8x128xi32>
    %45 = arith.sitofp %44 : vector<8x128xi32> to vector<8x128xf32>
    %c0_25 = arith.constant 0 : index
    %46 = arith.index_cast %c2_i32 : i32 to index
    %c0_26 = arith.constant 0 : index
    %c0_27 = arith.constant 0 : index
    %47 = vector.load %arg3[%c0_25, %46, %c0_26, %c0_27] : memref<1x8x8x128xf32, #tpu.memory_space<vmem>>, vector<1x1x8x128xf32>
    %48 = vector.shape_cast %47 : vector<1x1x8x128xf32> to vector<8x128xf32>
    %49 = vector.shape_cast %45 : vector<8x128xf32> to vector<1x1x8x128xf32>
    tpu.vector_store %arg3[%c0_25, %46, %c0_26, %c0_27], %49 {strides = array<i32>} : memref<1x8x8x128xf32, #tpu.memory_space<vmem>>, vector<1x1x8x128xf32>,
    %cst_28 = arith.constant 0.000000e+00 : f32
    %50 = vector.broadcast %cst_28 : f32 to vector<8x128xf32>
    %51 = arith.select %43, %50, %41 : vector<8x128xi1>, vector<8x128xf32>
    %c3_i32 = arith.constant 3 : i32
    %cst_29 = arith.constant 2.500000e-01 : f32
    %52 = vector.broadcast %cst_29 : f32 to vector<8x128xf32>
    %53 = arith.mulf %51, %52 : vector<8x128xf32>
    %c0_30 = arith.constant 0 : index
    %54 = arith.index_cast %c3_i32 : i32 to index
    %c0_31 = arith.constant 0 : index
    %c0_32 = arith.constant 0 : index
    %55 = vector.load %arg2[%c0_30, %54, %c0_31, %c0_32] : memref<1x8x8x128xf32, #tpu.memory_space<vmem>>, vector<1x1x8x128xf32>
    %56 = vector.shape_cast %55 : vector<1x1x8x128xf32> to vector<8x128xf32>
    %57 = arith.addf %53, %56 : vector<8x128xf32>
    %cst_33 = arith.constant 5.000000e-01 : f32
    %58 = vector.broadcast %cst_33 : f32 to vector<8x128xf32>
    %59 = arith.cmpf ogt, %57, %58 : vector<8x128xf32>
    %60 = arith.extui %59 : vector<8x128xi1> to vector<8x128xi32>
    %61 = arith.sitofp %60 : vector<8x128xi32> to vector<8x128xf32>
    %c0_34 = arith.constant 0 : index
    %62 = arith.index_cast %c3_i32 : i32 to index
    %c0_35 = arith.constant 0 : index
    %c0_36 = arith.constant 0 : index
    %63 = vector.load %arg3[%c0_34, %62, %c0_35, %c0_36] : memref<1x8x8x128xf32, #tpu.memory_space<vmem>>, vector<1x1x8x128xf32>
    %64 = vector.shape_cast %63 : vector<1x1x8x128xf32> to vector<8x128xf32>
    %65 = vector.shape_cast %61 : vector<8x128xf32> to vector<1x1x8x128xf32>
    tpu.vector_store %arg3[%c0_34, %62, %c0_35, %c0_36], %65 {strides = array<i32>} : memref<1x8x8x128xf32, #tpu.memory_space<vmem>>, vector<1x1x8x128xf32>,
    %cst_37 = arith.constant 0.000000e+00 : f32
    %66 = vector.broadcast %cst_37 : f32 to vector<8x128xf32>
    %67 = arith.select %59, %66, %57 : vector<8x128xi1>, vector<8x128xf32>
    %c4_i32 = arith.constant 4 : i32
    %cst_38 = arith.constant 2.500000e-01 : f32
    %68 = vector.broadcast %cst_38 : f32 to vector<8x128xf32>
    %69 = arith.mulf %67, %68 : vector<8x128xf32>
    %c0_39 = arith.constant 0 : index
    %70 = arith.index_cast %c4_i32 : i32 to index
    %c0_40 = arith.constant 0 : index
    %c0_41 = arith.constant 0 : index
    %71 = vector.load %arg2[%c0_39, %70, %c0_40, %c0_41] : memref<1x8x8x128xf32, #tpu.memory_space<vmem>>, vector<1x1x8x128xf32>
    %72 = vector.shape_cast %71 : vector<1x1x8x128xf32> to vector<8x128xf32>
    %73 = arith.addf %69, %72 : vector<8x128xf32>
    %cst_42 = arith.constant 5.000000e-01 : f32
    %74 = vector.broadcast %cst_42 : f32 to vector<8x128xf32>
    %75 = arith.cmpf ogt, %73, %74 : vector<8x128xf32>
    %76 = arith.extui %75 : vector<8x128xi1> to vector<8x128xi32>
    %77 = arith.sitofp %76 : vector<8x128xi32> to vector<8x128xf32>
    %c0_43 = arith.constant 0 : index
    %78 = arith.index_cast %c4_i32 : i32 to index
    %c0_44 = arith.constant 0 : index
    %c0_45 = arith.constant 0 : index
    %79 = vector.load %arg3[%c0_43, %78, %c0_44, %c0_45] : memref<1x8x8x128xf32, #tpu.memory_space<vmem>>, vector<1x1x8x128xf32>
    %80 = vector.shape_cast %79 : vector<1x1x8x128xf32> to vector<8x128xf32>
    %81 = vector.shape_cast %77 : vector<8x128xf32> to vector<1x1x8x128xf32>
    tpu.vector_store %arg3[%c0_43, %78, %c0_44, %c0_45], %81 {strides = array<i32>} : memref<1x8x8x128xf32, #tpu.memory_space<vmem>>, vector<1x1x8x128xf32>,
    %cst_46 = arith.constant 0.000000e+00 : f32
    %82 = vector.broadcast %cst_46 : f32 to vector<8x128xf32>
    %83 = arith.select %75, %82, %73 : vector<8x128xi1>, vector<8x128xf32>
    %c5_i32 = arith.constant 5 : i32
    %cst_47 = arith.constant 2.500000e-01 : f32
    %84 = vector.broadcast %cst_47 : f32 to vector<8x128xf32>
    %85 = arith.mulf %83, %84 : vector<8x128xf32>
    %c0_48 = arith.constant 0 : index
    %86 = arith.index_cast %c5_i32 : i32 to index
    %c0_49 = arith.constant 0 : index
    %c0_50 = arith.constant 0 : index
    %87 = vector.load %arg2[%c0_48, %86, %c0_49, %c0_50] : memref<1x8x8x128xf32, #tpu.memory_space<vmem>>, vector<1x1x8x128xf32>
    %88 = vector.shape_cast %87 : vector<1x1x8x128xf32> to vector<8x128xf32>
    %89 = arith.addf %85, %88 : vector<8x128xf32>
    %cst_51 = arith.constant 5.000000e-01 : f32
    %90 = vector.broadcast %cst_51 : f32 to vector<8x128xf32>
    %91 = arith.cmpf ogt, %89, %90 : vector<8x128xf32>
    %92 = arith.extui %91 : vector<8x128xi1> to vector<8x128xi32>
    %93 = arith.sitofp %92 : vector<8x128xi32> to vector<8x128xf32>
    %c0_52 = arith.constant 0 : index
    %94 = arith.index_cast %c5_i32 : i32 to index
    %c0_53 = arith.constant 0 : index
    %c0_54 = arith.constant 0 : index
    %95 = vector.load %arg3[%c0_52, %94, %c0_53, %c0_54] : memref<1x8x8x128xf32, #tpu.memory_space<vmem>>, vector<1x1x8x128xf32>
    %96 = vector.shape_cast %95 : vector<1x1x8x128xf32> to vector<8x128xf32>
    %97 = vector.shape_cast %93 : vector<8x128xf32> to vector<1x1x8x128xf32>
    tpu.vector_store %arg3[%c0_52, %94, %c0_53, %c0_54], %97 {strides = array<i32>} : memref<1x8x8x128xf32, #tpu.memory_space<vmem>>, vector<1x1x8x128xf32>,
    %cst_55 = arith.constant 0.000000e+00 : f32
    %98 = vector.broadcast %cst_55 : f32 to vector<8x128xf32>
    %99 = arith.select %91, %98, %89 : vector<8x128xi1>, vector<8x128xf32>
    %c6_i32 = arith.constant 6 : i32
    %cst_56 = arith.constant 2.500000e-01 : f32
    %100 = vector.broadcast %cst_56 : f32 to vector<8x128xf32>
    %101 = arith.mulf %99, %100 : vector<8x128xf32>
    %c0_57 = arith.constant 0 : index
    %102 = arith.index_cast %c6_i32 : i32 to index
    %c0_58 = arith.constant 0 : index
    %c0_59 = arith.constant 0 : index
    %103 = vector.load %arg2[%c0_57, %102, %c0_58, %c0_59] : memref<1x8x8x128xf32, #tpu.memory_space<vmem>>, vector<1x1x8x128xf32>
    %104 = vector.shape_cast %103 : vector<1x1x8x128xf32> to vector<8x128xf32>
    %105 = arith.addf %101, %104 : vector<8x128xf32>
    %cst_60 = arith.constant 5.000000e-01 : f32
    %106 = vector.broadcast %cst_60 : f32 to vector<8x128xf32>
    %107 = arith.cmpf ogt, %105, %106 : vector<8x128xf32>
    %108 = arith.extui %107 : vector<8x128xi1> to vector<8x128xi32>
    %109 = arith.sitofp %108 : vector<8x128xi32> to vector<8x128xf32>
    %c0_61 = arith.constant 0 : index
    %110 = arith.index_cast %c6_i32 : i32 to index
    %c0_62 = arith.constant 0 : index
    %c0_63 = arith.constant 0 : index
    %111 = vector.load %arg3[%c0_61, %110, %c0_62, %c0_63] : memref<1x8x8x128xf32, #tpu.memory_space<vmem>>, vector<1x1x8x128xf32>
    %112 = vector.shape_cast %111 : vector<1x1x8x128xf32> to vector<8x128xf32>
    %113 = vector.shape_cast %109 : vector<8x128xf32> to vector<1x1x8x128xf32>
    tpu.vector_store %arg3[%c0_61, %110, %c0_62, %c0_63], %113 {strides = array<i32>} : memref<1x8x8x128xf32, #tpu.memory_space<vmem>>, vector<1x1x8x128xf32>,
    %cst_64 = arith.constant 0.000000e+00 : f32
    %114 = vector.broadcast %cst_64 : f32 to vector<8x128xf32>
    %115 = arith.select %107, %114, %105 : vector<8x128xi1>, vector<8x128xf32>
    %c7_i32 = arith.constant 7 : i32
    %cst_65 = arith.constant 2.500000e-01 : f32
    %116 = vector.broadcast %cst_65 : f32 to vector<8x128xf32>
    %117 = arith.mulf %115, %116 : vector<8x128xf32>
    %c0_66 = arith.constant 0 : index
    %118 = arith.index_cast %c7_i32 : i32 to index
    %c0_67 = arith.constant 0 : index
    %c0_68 = arith.constant 0 : index
    %119 = vector.load %arg2[%c0_66, %118, %c0_67, %c0_68] : memref<1x8x8x128xf32, #tpu.memory_space<vmem>>, vector<1x1x8x128xf32>
    %120 = vector.shape_cast %119 : vector<1x1x8x128xf32> to vector<8x128xf32>
    %121 = arith.addf %117, %120 : vector<8x128xf32>
    %cst_69 = arith.constant 5.000000e-01 : f32
    %122 = vector.broadcast %cst_69 : f32 to vector<8x128xf32>
    %123 = arith.cmpf ogt, %121, %122 : vector<8x128xf32>
    %124 = arith.extui %123 : vector<8x128xi1> to vector<8x128xi32>
    %125 = arith.sitofp %124 : vector<8x128xi32> to vector<8x128xf32>
    %c0_70 = arith.constant 0 : index
    %126 = arith.index_cast %c7_i32 : i32 to index
    %c0_71 = arith.constant 0 : index
    %c0_72 = arith.constant 0 : index
    %127 = vector.load %arg3[%c0_70, %126, %c0_71, %c0_72] : memref<1x8x8x128xf32, #tpu.memory_space<vmem>>, vector<1x1x8x128xf32>
    %128 = vector.shape_cast %127 : vector<1x1x8x128xf32> to vector<8x128xf32>
    %129 = vector.shape_cast %125 : vector<8x128xf32> to vector<1x1x8x128xf32>
    tpu.vector_store %arg3[%c0_70, %126, %c0_71, %c0_72], %129 {strides = array<i32>} : memref<1x8x8x128xf32, #tpu.memory_space<vmem>>, vector<1x1x8x128xf32>,
    %cst_73 = arith.constant 0.000000e+00 : f32
    %130 = vector.broadcast %cst_73 : f32 to vector<8x128xf32>
    %131 = arith.select %123, %130, %121 : vector<8x128xi1>, vector<8x128xf32>
    %c8_i32 = arith.constant 8 : i32
    %c0_74 = arith.constant 0 : index
    %c0_75 = arith.constant 0 : index
    %132 = vector.load %arg4[%c0_74, %c0_75] : memref<8x128xf32, #tpu.memory_space<vmem>>, vector<8x128xf32>
    tpu.vector_store %arg4[%c0_74, %c0_75], %131 {strides = array<i32>} : memref<8x128xf32, #tpu.memory_space<vmem>>, vector<8x128xf32>,
    return
  }
  func.func @transform_0(%arg0: i32, %arg1: i32) -> (i32, i32, i32, i32) {
    %c0_i32 = arith.constant 0 : i32
    %c0_i32_0 = arith.constant 0 : i32
    %c0_i32_1 = arith.constant 0 : i32
    return %arg0, %arg1, %c0_i32, %c0_i32_0 : i32, i32, i32, i32
  }
  func.func @transform_1(%arg0: i32, %arg1: i32) -> (i32, i32, i32, i32) {
    %c0_i32 = arith.constant 0 : i32
    %c0_i32_0 = arith.constant 0 : i32
    %c0_i32_1 = arith.constant 0 : i32
    return %arg0, %arg1, %c0_i32, %c0_i32_0 : i32, i32, i32, i32
  }
}

</mosaic_0001>

<bundles_post_ra>
// kernel: tpu_custom_call.1
= control target key start
LH: loop header
LB: loop body
LE: loop exit
PB: predicated region body
PF: predicated region fallthrough
CT: control target
= control target key end

     0   :  { %6 = vsyncpa [#allocation4], 0  ;;  %s743_s0 = inlined_call_operand.hbm [shape: f32[2,8,8,128], index: 0, kind: input, shape index: {}]   ;;  %s744_s1 = inlined_call_operand.hbm [shape: f32[2,8,8,128], index: 1, kind: output, shape index: {}]  }
   0x1   :  { %8 = vsyncpa [#allocation4 + $0x1], 0 }
   0x2   :  { %9 = vsyncpa [#allocation5], 0 }
   0x3   :  { %11 = vsyncpa [#allocation5 + $0x1], 0  ;;  %s576_s6 = smov 0   ;;  %s578_s7 = smov 0  }
   0x4   :  { %s580_s8 = smov 0   ;;  %s582_s9 = smov 0  }
   0x5   :  { %s584_s10 = smov 0   ;;  %s586_s11 = smov 0  }
   0x6 LB: > { %s343_s12 = sadd.s32 4294967295, %s557_s11   ;;  %s344_s13 = sadd.s32 4294967294, %s557_s11   ;;  %s557_s11 = sphi %s586_s11, %s17_s11   ;;  %s553_s10 = sphi %s584_s10, %s755_s10   ;;  %s549_s9 = sphi %s582_s9, %s754_s9   ;;  %s545_s8 = sphi %s580_s8, %s753_s8   ;;  %s541_s7 = sphi %s578_s7, %s752_s7   ;;  %s537_s6 = sphi %s576_s6, %s751_s6  }
   0x7   : > { %s29_s14 = sadd.s32 1, %s553_s10  ;;  %s38_s15 = sadd.s32 1, %s545_s8 }
   0x8   : > { %p31_p0 = scmp.ge.s32.totalorder %s29_s14, 2  ;;  %p45_p1 = scmp.ne.s32.totalorder %s545_s8, %s541_s7 }
   0x9   : > { %p46_p2 = scmp.eq.s32.totalorder %s557_s11, 0  ;;  %p51_p3 = scmp.ne.s32.totalorder %s541_s7, %s537_s6 }
   0xa   : > { %s757_s14 = smov (%p31_p0, %s29_s14), 0  ;;  %p52_p5 = scmp.eq.s32.totalorder %s343_s12, 0 }
   0xb   : > { %p617_p4 = por %p46_p2, %p45_p1  ;;  %s33_s17 = ssub.s32 %s553_s10, %s757_s14 }
   0xc   : > { %p77_p6 = scmp.eq.s32.totalorder %s343_s12, 1  ;;  %p36_p7 = scmp.eq.s32.totalorder %s33_s17, 0 }
   0xd   : > { %p623_p8 = por %p52_p5, %p51_p3  ;;  %p83_p10 = scmp.eq.s32.totalorder %s344_s13, 1 }
   0xe   : > { %p627_p9 = por %p77_p6, %p45_p1  ;;  %p394_p13 = scmp.lt.s32.totalorder %s557_s11, 2 }
   0xf   : > { %s632_s20 = scalar_select %p36_p7, %s545_s8, %s38_s15  }
  0x10   : > { %p634_p11 = por %p83_p10, %p51_p3  ;;  %s103_s22 = sand.u32 1, %s545_s8  }
  0x11   : > { %s347_s23 = sshll.u32 %s103_s22, 6  ;;  %s380_s24 = sshll.u32 %s553_s10, 10 }
  0x12   : > { %s115_s27 = scalar_lea.hbm %s743_s0, %s380_s24  ;;  %s107_s28 = scalar_lea.vmem [#allocation3], %s347_s23 }
  0x13   : > { %s116_s29 = sshll.u32 %s107_s28, 4  ;;  %p647_p0 = pnand %p394_p13, %p617_p4  ;;  %s117_s29 = int_to_ptr.vmem [resolvable:$true] %s116_s29 }
  0x14   : > { %p350_p1 = scmp.ge.s32.totalorder %s557_s11, 1  ;;  %s104_s2 = scalar_lea.sflag [#allocation4], %s103_s22 }
  0x15   : > { %p451_p2 = pneg %p647_p0  ;;  %s462_s3 = scalar_lea.vmem %s117_s29, 1024 }
  0x16   : > { %p463_p3 = scmp.ne.s32.totalorder %s117_s29, %s462_s3  ;;  %s559_s4 = smov [#allocation3]  }
  0x17   : > { %s467_s5 = sshll.u32 %s559_s4, 4  ;;  %s468_s5 = int_to_ptr.vmem [resolvable:$false] %s467_s5 }
  0x18   : > { %p465_p5 = pnand %p463_p3, %p451_p2  ;;  %s469_s12 = scalar_lea.vmem %s468_s5, 2048 }
  0x19   : > { %p470_p7 = scmp.lt.s32.totalorder %s117_s29, %s468_s5  ;;  %p471_p10 = scmp.lt.s32.totalorder %s469_s12, %s462_s3 }
  0x1a   : > { %p466_p6 = pneg %p465_p5 }
  0x1b   : > { %p472_p12 = por %p471_p10, %p470_p7 }
  0x1d   : > { %p473_p4 = pnand %p472_p12, %p466_p6 }
  0x1f   : > { %476 = shalt.err (!%p473_p4)
}
  0x20   : > { %s560_s13 = smov 128   ;;  %s561_s15 = smov 8  }
  0x21   : > { %389 = dma.hbm_to_vmem [thread:$0]  (!%p647_p0), %s115_s27, 1024, %s117_s29, %s104_s2, %s560_s13, %s560_s13, %s561_s15  }
  0x22   : > { %p124_p13 = scmp.lt.s32.totalorder %s557_s11, 3 }
  0x24   : > { %p125_p2 = pnand %p350_p1, %p124_p13 }
  0x25   : > { %s660_s16 = sand.u32 (!%p125_p2), 1, %s541_s7  }
  0x26   : > { %128 = sbr.rel (%p125_p2) target bundleno = 103 (0x67), region = 24  ;;  %s351_s17 = sshll.u32 (!%p125_p2), %s660_s16, 6 }
  0x27   : > { %s131_s22 = scalar_lea.sflag (!%p125_p2), [#allocation4], %s660_s16  ;;  %s664_s23 = scalar_lea.vmem (!%p125_p2), [#allocation3], %s351_s17 }
  0x2b   : > { %528 = dma.done.wait (%p623_p8), %s131_s22, 1024  }
  0x2c   : > { %530 = vsyncadd (%p623_p8), %s131_s22, 4294966272  ;;  %v162_v0 = vld [vmem:[%s664_s23] sm:$0xff]  ;;  %v562_v1 = vmov 0.0   ;;  %v354_v4 = vld [vmem:[%s664_s23 + $0x8] sm:$0xff]  ;;  %s672_s24 = scalar_lea.vmem [#allocation6], %s351_s17  ;;  %s381_s25 = sshll.u32 %s549_s9, 10 }
  0x2d   : > { %vm164_vm0 = vcmp.gt.f32.partialorder %v162_v0, 0.5  ;;  %v357_v9 = vld [vmem:[%s664_s23 + $0x10] sm:$0xff]  ;;  %v360_v14 = vld [vmem:[%s664_s23 + $0x18] sm:$0xff]  ;;  %v363_v19 = vld [vmem:[%s664_s23 + $0x20] sm:$0xff]  ;;  %s256_s18 = sshll.u32 %s672_s24, 4  ;;  %s694_s28 = scalar_lea.hbm %s744_s1, %s381_s25  ;;  %s689_s18 = int_to_ptr.vmem [resolvable:$true] %s256_s18 }
  0x2e   : > { %v353_v2 = vsel %vm164_vm0, 1.0, %v562_v1  ;;  %v168_v3 = vsel %vm164_vm0, 0.0, %v162_v0  ;;  %v366_v24 = vld [vmem:[%s664_s23 + $0x28] sm:$0xff]  ;;  %v369_v29 = vld [vmem:[%s664_s23 + $0x30] sm:$0xff]  ;;  %v372_v34 = vld [vmem:[%s664_s23 + $0x38] sm:$0xff]  ;;  %s241_s29 = scalar_lea.sflag [#allocation5], %s660_s16 }
  0x2f   : > { %167 = vst [vmem:[%s672_s24] sm:$0xff] %v353_v2  ;;  %v169_v5 = vmul.f32 0.25, %v168_v3  ;;  %s477_s30 = scalar_lea.vmem %s689_s18, 1024  ;;  %s563_s9 = smov [#allocation6]  }
  0x30   : > { %p478_p8 = scmp.ne.s32.totalorder %s689_s18, %s477_s30  ;;  %s481_s2 = sshll.u32 %s563_s9, 4  ;;  %s482_s2 = int_to_ptr.vmem [resolvable:$false] %s481_s2 }
  0x31   : > { %v172_v6 = vadd.f32 %v354_v4, %v169_v5  ;;  %s483_s3 = scalar_lea.vmem %s482_s2, 2048  ;;  %p484_p1 = scmp.lt.s32.totalorder %s689_s18, %s482_s2 }
  0x32   : > { %p479_p12 = pnand %p478_p8, %p627_p9  ;;  %p485_p3 = scmp.lt.s32.totalorder %s483_s3, %s477_s30 }
  0x33   : > { %vm173_vm1 = vcmp.gt.f32.partialorder %v172_v6, 0.5 }
  0x34   : > { %v355_v7 = vsel %vm173_vm1, 1.0, %v562_v1  ;;  %v178_v8 = vsel %vm173_vm1, 0.0, %v172_v6  ;;  %p480_p0 = pneg %p479_p12  ;;  %p486_p5 = por %p485_p3, %p484_p1 }
  0x35   : > { %356 = vst [vmem:[%s672_s24 + $0x8] sm:$0xff] %v355_v7  ;;  %v179_v10 = vmul.f32 0.25, %v178_v8 }
  0x36   : > { %p487_p6 = pnand %p486_p5, %p480_p0 }
  0x37   : > { %v182_v11 = vadd.f32 %v357_v9, %v179_v10 }
  0x39   : > { %vm183_vm2 = vcmp.gt.f32.partialorder %v182_v11, 0.5 }
  0x3a   : > { %v358_v12 = vsel %vm183_vm2, 1.0, %v562_v1  ;;  %v188_v13 = vsel %vm183_vm2, 0.0, %v182_v11 }
  0x3b   : > { %359 = vst [vmem:[%s672_s24 + $0x10] sm:$0xff] %v358_v12  ;;  %v189_v15 = vmul.f32 0.25, %v188_v13 }
  0x3d   : > { %v192_v16 = vadd.f32 %v360_v14, %v189_v15 }
  0x3f   : > { %vm193_vm3 = vcmp.gt.f32.partialorder %v192_v16, 0.5 }
  0x40   : > { %v361_v17 = vsel %vm193_vm3, 1.0, %v562_v1  ;;  %v198_v18 = vsel %vm193_vm3, 0.0, %v192_v16 }
  0x41   : > { %362 = vst [vmem:[%s672_s24 + $0x18] sm:$0xff] %v361_v17  ;;  %v199_v20 = vmul.f32 0.25, %v198_v18 }
  0x43   : > { %v202_v21 = vadd.f32 %v363_v19, %v199_v20 }
  0x45   : > { %vm203_vm4 = vcmp.gt.f32.partialorder %v202_v21, 0.5 }
  0x46   : > { %v364_v22 = vsel %vm203_vm4, 1.0, %v562_v1  ;;  %v208_v23 = vsel %vm203_vm4, 0.0, %v202_v21 }
  0x47   : > { %365 = vst [vmem:[%s672_s24 + $0x20] sm:$0xff] %v364_v22  ;;  %v209_v25 = vmul.f32 0.25, %v208_v23 }
  0x49   : > { %v212_v26 = vadd.f32 %v366_v24, %v209_v25 }
  0x4b   : > { %vm213_vm5 = vcmp.gt.f32.partialorder %v212_v26, 0.5 }
  0x4c   : > { %v367_v27 = vsel %vm213_vm5, 1.0, %v562_v1  ;;  %v218_v28 = vsel %vm213_vm5, 0.0, %v212_v26 }
  0x4d   : > { %368 = vst [vmem:[%s672_s24 + $0x28] sm:$0xff] %v367_v27  ;;  %v219_v30 = vmul.f32 0.25, %v218_v28 }
  0x4f   : > { %v222_v31 = vadd.f32 %v369_v29, %v219_v30 }
  0x51   : > { %vm223_vm6 = vcmp.gt.f32.partialorder %v222_v31, 0.5 }
  0x52   : > { %v370_v32 = vsel %vm223_vm6, 1.0, %v562_v1  ;;  %v228_v33 = vsel %vm223_vm6, 0.0, %v222_v31 }
  0x53   : > { %371 = vst [vmem:[%s672_s24 + $0x30] sm:$0xff] %v370_v32  ;;  %v229_v35 = vmul.f32 0.25, %v228_v33 }
  0x55   : > { %v232_v36 = vadd.f32 %v372_v34, %v229_v35 }
  0x57   : > { %vm233_vm7 = vcmp.gt.f32.partialorder %v232_v36, 0.5 }
  0x58   : > { %v373_v37 = vsel %vm233_vm7, 1.0, %v562_v1 }
  0x59   : > { %374 = vst [vmem:[%s672_s24 + $0x38] sm:$0xff] %v373_v37 }
  0x5a   : > { %490 = shalt.err (!%p487_p6)
}
  0x5b   : > { %s491_s4 = scalar_lea.hbm %s694_s28, 1024  ;;  %s495_s13 = scalar_lea.hbm %s744_s1, 2048 }
  0x5c   : > { %p492_p7 = scmp.ne.s32.totalorder %s694_s28, %s491_s4  ;;  %p496_p13 = scmp.lt.s32.totalorder %s694_s28, %s744_s1 }
  0x5d   : > { %p497_p2 = scmp.lt.s32.totalorder %s495_s13, %s491_s4 }
  0x5e   : > { %p493_p10 = pnand %p492_p7, %p627_p9 }
  0x5f   : > { %p498_p8 = por %p497_p2, %p496_p13 }
  0x60   : > { %p494_p4 = pneg %p493_p10 }
  0x62   : > { %p499_p12 = pnand %p498_p8, %p494_p4 }
  0x64   : > { %502 = shalt.err (!%p499_p12)
}
  0x65   : > { %s564_s22 = smov 128   ;;  %s565_s23 = smov 8  }
  0x66   : > { %384 = dma.vmem_to_hbm [thread:$0]  (%p627_p9), %s689_s18, 1024, %s694_s28, %s241_s29, %s564_s22, %s564_s22, %s565_s23  }
  0x67 PF: > { %s271_s24 = sand.u32 1, %s537_s6   ;;  %p750_p0 = scmp.ge.s32.totalorder %s557_s11, 2 }
  0x68   : > { %s272_s25 = scalar_lea.sflag [#allocation5], %s271_s24 }
  0x69   : > { %p391_p1 = pnand %p750_p0, %p634_p11 }
  0x6b   : > { %p392_p3 = pneg %p391_p1 }
  0x6d   : > { %532 = dma.done.wait (%p392_p3), %s272_s25, 1024  }
  0x6e   : > { %534 = vsyncadd (%p392_p3), %s272_s25, 4294966272  ;;  %s17_s11 = sadd.s32 1, %s557_s11   ;;  %s751_s6 = smov %s541_s7 }
  0x6f   : > { %p14_p5 = scmp.ge.s32.totalorder %s17_s11, 4   ;;  %s752_s7 = smov %s545_s8 }
  0x70   : > { %s753_s8 = smov %s632_s20  ;;  %s754_s9 = smov %s553_s10 }
  0x71   : > { %s755_s10 = smov %s757_s14  ;;  %16 = sbr.rel (!%p14_p5) target bundleno = 6 (0x6), region = 87 }
  0x76   :  { %277 = vsyncpa [#allocation4], 1 }
  0x77   :  { %279 = vsyncpa [#allocation4 + $0x1], 1 }
  0x78   :  { %280 = vsyncpa [#allocation5], 1 }
  0x79   :  { %282 = vsyncpa [#allocation5 + $0x1], 1 }

</bundles_post_ra>
